<compile_context>
chip_gen: v6e
topology: v6e:2x2x1
jax: 0.10.0
libtpu: 0.0.40
codegen_flags: <defaults>
</compile_context>

<pallas_src>
import functools

import jax
import jax.numpy as jnp
from jax.experimental import pallas as pl
from jax.experimental.pallas import tpu as pltpu


def masked_attention_kernel(q_ref, k_ref, v_ref, m_ref, w_ref, o_ref,
                            kp_ref, vp_ref, *, mm_dtype, approx_recip):
    """One (batch-block, query-block) grid step.

    q_ref : (Bb, Tq, D)   mm_dtype   query rows for this tile
    k_ref : (Bb, S,  D)   mm_dtype   full keys   for this batch block
    v_ref : (Bb, S,  D)   mm_dtype   full values for this batch block
    m_ref : (Bb, Tq, 1)   f32        multiplicative per-query mask
    w_ref : (3, D, d_k)   mm_dtype   fused [Wq; Wk; Wv], pre-transposed
    o_ref : (Bb, Tq, d_k)
    kp_ref / vp_ref : (Bb, S, d_k) mm_dtype VMEM scratch — K/V projections,
        computed once per batch block (query-tile 0) and reused for all tiles.
    """
    Bb, Tq, D = q_ref.shape
    S = k_ref.shape[1]
    d_k = w_ref.shape[-1]
    scale = float(d_k) ** -0.5

    qi = pl.program_id(1)

    # --- K/V projections: once per batch block, cached as mm_dtype (ready MXU
    #     operands; no per-query-tile recompute or recast).
    @pl.when(qi == 0)
    def _():
        k2 = k_ref[...].reshape(Bb * S, D)   # S multiple of 8 -> sublane-aligned merge
        v2 = v_ref[...].reshape(Bb * S, D)
        kp = jnp.dot(k2, w_ref[1], preferred_element_type=jnp.float32)
        vp = jnp.dot(v2, w_ref[2], preferred_element_type=jnp.float32)
        kp_ref[...] = kp.reshape(Bb, S, d_k).astype(kp_ref.dtype)
        vp_ref[...] = vp.reshape(Bb, S, d_k).astype(vp_ref.dtype)

    # --- Q projection for this tile; fold BOTH the softmax scale and the
    #     multiplicative per-query mask into the small (Tq, d_k) qp tile
    #     (per-row scalar: (qp * m) @ kp^T == m * (qp @ kp^T)).
    q2 = q_ref[...].reshape(Bb * Tq, D)      # Tq multiple of 8 (or == S)
    qp = jnp.dot(q2, w_ref[0], preferred_element_type=jnp.float32)   # (Bb*Tq, d_k) f32
    qp = qp.reshape(Bb, Tq, d_k) * (m_ref[...] * scale)              # (Bb,Tq,1) bcast

    # --- Scores: batched last-dim contraction (no explicit kp transpose / XLU).
    s = jnp.einsum('bqd,bkd->bqk', qp.astype(mm_dtype), kp_ref[...],
                   preferred_element_type=jnp.float32)               # (Bb, Tq, S) f32

    # --- Softmax over keys; normalization deferred past the AV matmul so the
    #     O(Tq*S) tile is only touched by max/exp/sum.
    s = s - jnp.max(s, axis=-1, keepdims=True)
    e = jnp.exp(s)
    rowsum = jnp.sum(e, axis=-1, keepdims=True)                      # (Bb, Tq, 1)

    y = jnp.einsum('bqk,bkd->bqd', e.astype(mm_dtype), vp_ref[...],
                   preferred_element_type=jnp.float32)               # (Bb, Tq, d_k)
    y = y * pl.reciprocal(rowsum, approx=approx_recip)               # EUP slot
    o_ref[...] = y.astype(o_ref.dtype)


def masked_attention_head(q, k, v, m, wq, wk, wv, *,
                          mm_dtype=jnp.bfloat16,
                          batch_blocks=1,
                          q_block=None,
                          approx_recip=None,
                          vmem_limit_bytes=None):
    """q, k, v: (B, S, D); m: (B, S); wq/wk/wv: torch-layout (d_k, D) Linear weights.

    mm_dtype:         MXU operand dtype (accumulation is always f32).
                      float32 reproduces torch f32 semantics (and uses an exact
                      reciprocal); bfloat16 is the perf path.
    batch_blocks:     grid steps along batch ("parallel" axis).  Use >=2 on v7x
                      so both TensorCores are fed; 1 is fine on v5e/v6e.
    q_block:          query rows per grid step (must divide S; multiple of 8 or
                      == S).  Defaults to min(S, 512).
    vmem_limit_bytes: optional scoped-VMEM raise for large tiles (v6e/v5e
                      defaults of 32/16 MiB are hit well before physical VMEM).
    """
    B, S, D = q.shape
    d_k = wq.shape[0]
    out_dtype = q.dtype

    assert B % batch_blocks == 0, "batch_blocks must divide B"
    Bb = B // batch_blocks

    if q_block is None:
        q_block = S if S <= 512 else 512
    assert S % q_block == 0, "q_block must divide S"
    assert q_block == S or q_block % 8 == 0, "q_block must be sublane-aligned"
    num_q = S // q_block

    if approx_recip is None:
        approx_recip = mm_dtype != jnp.float32

    # Cast operands to the MXU dtype in the wrapper: halves HBM->VMEM DMA bytes
    # and input VMEM footprint on the bf16 path, removes in-kernel converts.
    q = q.astype(mm_dtype)
    k = k.astype(mm_dtype)
    v = v.astype(mm_dtype)

    # Fused projection weights: one (3, D, d_k) operand (single DMA, single
    # resident VMEM buffer), pre-transposed so the kernel computes x @ W.T
    # (torch Linear without bias).
    w = jnp.stack([wq.T, wk.T, wv.T], axis=0).astype(mm_dtype)

    # Mask broadcasts over d_k inside the kernel -> (B, S, 1); kept f32.
    m3 = m.reshape(B, S, 1).astype(jnp.float32)

    q_spec = pl.BlockSpec((Bb, q_block, D), lambda b, qi: (b, qi, 0))
    kv_spec = pl.BlockSpec((Bb, S, D), lambda b, qi: (b, 0, 0))   # resident per batch blk
    m_spec = pl.BlockSpec((Bb, q_block, 1), lambda b, qi: (b, qi, 0))
    w_spec = pl.BlockSpec((3, D, d_k), lambda b, qi: (0, 0, 0))
    out_spec = pl.BlockSpec((Bb, q_block, d_k), lambda b, qi: (b, qi, 0))

    kernel = functools.partial(masked_attention_kernel,
                               mm_dtype=mm_dtype, approx_recip=approx_recip)

    return pl.pallas_call(
        kernel,
        out_shape=jax.ShapeDtypeStruct((B, S, d_k), out_dtype),
        grid=(batch_blocks, num_q),
        in_specs=[q_spec, kv_spec, kv_spec, m_spec, w_spec],
        out_specs=out_spec,
        scratch_shapes=[pltpu.VMEM((Bb, S, d_k), mm_dtype),   # cached K projection
                        pltpu.VMEM((Bb, S, d_k), mm_dtype)],  # cached V projection
        compiler_params=pltpu.CompilerParams(
            dimension_semantics=("parallel", "arbitrary"),
            vmem_limit_bytes=vmem_limit_bytes),
    )(q, k, v, m3, w)


if __name__ == "__main__":
    B, S, d_model, h = 2, 8, 32, 4
    d_k = d_model // h

    key = jax.random.PRNGKey(0)
    k1, k2, k3, k4, k5, k6, k7 = jax.random.split(key, 7)

    q = jax.random.normal(k1, (B, S, d_model), jnp.float32)
    kk = jax.random.normal(k2, (B, S, d_model), jnp.float32)
    v = jax.random.normal(k3, (B, S, d_model), jnp.float32)
    # 0/1 multiplicative mask per query position (as in the torch forward)
    m = (jax.random.uniform(k4, (B, S)) > 0.3).astype(jnp.float32)

    # nn.Linear weights are (out, in) = (d_k, d_model); xavier_normal_:
    # std = sqrt(2 / (fan_in + fan_out))
    std = (2.0 / (d_model + d_k)) ** 0.5
    wq = jax.random.normal(k5, (d_k, d_model), jnp.float32) * std
    wk = jax.random.normal(k6, (d_k, d_model), jnp.float32) * std
    wv = jax.random.normal(k7, (d_k, d_model), jnp.float32) * std

    def ref(q, k, v, m, wq, wk, wv, mm_dtype=jnp.float32):
        # Torch-faithful forward; operands optionally rounded to mm_dtype to
        # mirror the MXU bf16-in / f32-accumulate path.
        c = lambda x: x.astype(mm_dtype).astype(jnp.float32)
        qp = c(q) @ c(wq.T)
        kp = c(k) @ c(wk.T)
        vp = c(v) @ c(wv.T)
        a = jnp.einsum('bqd,bkd->bqk', c(qp), c(kp)) / (qp.shape[-1] ** 0.5)
        a = a * m[..., None]
        p = jax.nn.softmax(a, axis=-1)
        return jnp.einsum('bqk,bkd->bqd', c(p), c(vp))

    # 1) f32 MXU path (exact reciprocal) vs the torch-faithful f32 reference.
    y32 = jax.block_until_ready(
        masked_attention_head(q, kk, v, m, wq, wk, wv, mm_dtype=jnp.float32))
    y32_ref = ref(q, kk, v, m, wq, wk, wv, mm_dtype=jnp.float32)
    assert y32.shape == (B, S, d_k)
    assert jnp.allclose(y32, y32_ref, atol=5e-3, rtol=5e-3), "f32 path mismatch vs reference"

    # 2) Default perf path (bf16 MXU operands) vs a precision-matched reference.
    y16 = jax.block_until_ready(
        masked_attention_head(q, kk, v, m, wq, wk, wv))       # mm_dtype=bf16 default
    y16_ref = ref(q, kk, v, m, wq, wk, wv, mm_dtype=jnp.bfloat16)
    assert y16.shape == (B, S, d_k)
    assert jnp.allclose(y16, y16_ref, atol=2e-2, rtol=2e-2), "bf16 path mismatch vs reference"

    # 3) >=2-step "parallel" batch axis (v7x: feed both TensorCores).
    y16b = jax.block_until_ready(
        masked_attention_head(q, kk, v, m, wq, wk, wv, batch_blocks=2))
    assert jnp.allclose(y16b, y16_ref, atol=2e-2, rtol=2e-2), "batch_blocks=2 mismatch"

    print("KERNEL_OK")
</pallas_src>

<mosaic_0001>
module attributes {stable_mosaic.version = 11 : i64} {
  func.func @masked_attention_kernel(%arg0: i32, %arg1: i32, %arg2: memref<2x8x32xf32, #tpu.memory_space<vmem>>, %arg3: memref<2x8x32xf32, #tpu.memory_space<vmem>>, %arg4: memref<2x8x32xf32, #tpu.memory_space<vmem>>, %arg5: memref<2x8x1xf32, #tpu.memory_space<vmem>>, %arg6: memref<3x32x8xf32, #tpu.memory_space<vmem>>, %arg7: memref<2x8x8xf32, #tpu.memory_space<vmem>>, %arg8: memref<2x8x8xf32, #tpu.memory_space<vmem>>, %arg9: memref<2x8x8xf32, #tpu.memory_space<vmem>>) attributes {dimension_semantics = [#tpu.dimension_semantics<parallel>, #tpu.dimension_semantics<arbitrary>], iteration_bounds = array<i64: 1, 1>, scalar_prefetch = 0 : i64, scratch_operands = 2 : i64, tpu.core_type = #tpu.core_type<tc>, window_params = [{transform_indices = @transform_0, window_bounds = array<i64: 2, 8, 32>}, {transform_indices = @transform_1, window_bounds = array<i64: 2, 8, 32>}, {transform_indices = @transform_2, window_bounds = array<i64: 2, 8, 32>}, {transform_indices = @transform_3, window_bounds = array<i64: 2, 8, 1>}, {pipeline_mode = #tpu.pipeline_mode<synchronous>, transform_indices = @transform_4, window_bounds = array<i64: 3, 32, 8>}, {transform_indices = @transform_5, window_bounds = array<i64: 2, 8, 8>}]} {
    %c0_i32 = arith.constant 0 : i32
    %0 = arith.cmpi eq, %arg1, %c0_i32 : i32
    %1 = arith.extui %0 : i1 to i32
    %c0_i32_0 = arith.constant 0 : i32
    %2 = arith.cmpi ne, %1, %c0_i32_0 : i32
    scf.if %2 {
      %c0_23 = arith.constant 0 : index
      %c0_24 = arith.constant 0 : index
      %c0_25 = arith.constant 0 : index
      %29 = vector.load %arg3[%c0_23, %c0_24, %c0_25] : memref<2x8x32xf32, #tpu.memory_space<vmem>>, vector<2x8x32xf32>
      %30 = vector.shape_cast %29 : vector<2x8x32xf32> to vector<16x32xf32>
      %c0_26 = arith.constant 0 : index
      %c0_27 = arith.constant 0 : index
      %c0_28 = arith.constant 0 : index
      %31 = vector.load %arg4[%c0_26, %c0_27, %c0_28] : memref<2x8x32xf32, #tpu.memory_space<vmem>>, vector<2x8x32xf32>
      %32 = vector.shape_cast %31 : vector<2x8x32xf32> to vector<16x32xf32>
      %c1 = arith.constant 1 : index
      %c0_29 = arith.constant 0 : index
      %c0_30 = arith.constant 0 : index
      %33 = vector.load %arg6[%c1, %c0_29, %c0_30] : memref<3x32x8xf32, #tpu.memory_space<vmem>>, vector<1x32x8xf32>
      %34 = vector.shape_cast %33 : vector<1x32x8xf32> to vector<32x8xf32>
      %cst_31 = arith.constant dense<0.000000e+00> : vector<16x8xf32>
      %35 = tpu.matmul %30, %34, %cst_31 {dimension_numbers = #tpu.dot_dimension_numbers<[1], [0], [0], [1], [0, 0, 1, 1], [], []>} : vector<16x32xf32>, vector<32x8xf32>, vector<16x8xf32> -> vector<16x8xf32>
      %c2 = arith.constant 2 : index
      %c0_32 = arith.constant 0 : index
      %c0_33 = arith.constant 0 : index
      %36 = vector.load %arg6[%c2, %c0_32, %c0_33] : memref<3x32x8xf32, #tpu.memory_space<vmem>>, vector<1x32x8xf32>
      %37 = vector.shape_cast %36 : vector<1x32x8xf32> to vector<32x8xf32>
      %cst_34 = arith.constant dense<0.000000e+00> : vector<16x8xf32>
      %38 = tpu.matmul %32, %37, %cst_34 {dimension_numbers = #tpu.dot_dimension_numbers<[1], [0], [0], [1], [0, 0, 1, 1], [], []>} : vector<16x32xf32>, vector<32x8xf32>, vector<16x8xf32> -> vector<16x8xf32>
      %39 = vector.shape_cast %35 : vector<16x8xf32> to vector<2x8x8xf32>
      %c0_35 = arith.constant 0 : index
      %c0_36 = arith.constant 0 : index
      %c0_37 = arith.constant 0 : index
      %40 = vector.load %arg8[%c0_35, %c0_36, %c0_37] : memref<2x8x8xf32, #tpu.memory_space<vmem>>, vector<2x8x8xf32>
      tpu.vector_store %arg8[%c0_35, %c0_36, %c0_37], %39 {strides = array<i32>} : memref<2x8x8xf32, #tpu.memory_space<vmem>>, vector<2x8x8xf32>,
      %41 = vector.shape_cast %38 : vector<16x8xf32> to vector<2x8x8xf32>
      %c0_38 = arith.constant 0 : index
      %c0_39 = arith.constant 0 : index
      %c0_40 = arith.constant 0 : index
      %42 = vector.load %arg9[%c0_38, %c0_39, %c0_40] : memref<2x8x8xf32, #tpu.memory_space<vmem>>, vector<2x8x8xf32>
      tpu.vector_store %arg9[%c0_38, %c0_39, %c0_40], %41 {strides = array<i32>} : memref<2x8x8xf32, #tpu.memory_space<vmem>>, vector<2x8x8xf32>,
    } else {
    }
    %c0 = arith.constant 0 : index
    %c0_1 = arith.constant 0 : index
    %c0_2 = arith.constant 0 : index
    %3 = vector.load %arg2[%c0, %c0_1, %c0_2] : memref<2x8x32xf32, #tpu.memory_space<vmem>>, vector<2x8x32xf32>
    %4 = vector.shape_cast %3 : vector<2x8x32xf32> to vector<16x32xf32>
    %c0_3 = arith.constant 0 : index
    %c0_4 = arith.constant 0 : index
    %c0_5 = arith.constant 0 : index
    %5 = vector.load %arg6[%c0_3, %c0_4, %c0_5] : memref<3x32x8xf32, #tpu.memory_space<vmem>>, vector<1x32x8xf32>
    %6 = vector.shape_cast %5 : vector<1x32x8xf32> to vector<32x8xf32>
    %cst = arith.constant dense<0.000000e+00> : vector<16x8xf32>
    %7 = tpu.matmul %4, %6, %cst {dimension_numbers = #tpu.dot_dimension_numbers<[1], [0], [0], [1], [0, 0, 1, 1], [], []>} : vector<16x32xf32>, vector<32x8xf32>, vector<16x8xf32> -> vector<16x8xf32>
    %8 = vector.shape_cast %7 : vector<16x8xf32> to vector<2x8x8xf32>
    %c0_6 = arith.constant 0 : index
    %c0_7 = arith.constant 0 : index
    %c0_8 = arith.constant 0 : index
    %9 = vector.load %arg5[%c0_6, %c0_7, %c0_8] : memref<2x8x1xf32, #tpu.memory_space<vmem>>, vector<2x8x1xf32>
    %cst_9 = arith.constant 0.353553385 : f32
    %10 = vector.broadcast %cst_9 : f32 to vector<2x8x1xf32>
    %11 = arith.mulf %9, %10 : vector<2x8x1xf32>
    %12 = vector.broadcast %11 : vector<2x8x1xf32> to vector<2x8x8xf32>
    %13 = arith.mulf %8, %12 : vector<2x8x8xf32>
    %c0_10 = arith.constant 0 : index
    %c0_11 = arith.constant 0 : index
    %c0_12 = arith.constant 0 : index
    %14 = vector.load %arg8[%c0_10, %c0_11, %c0_12] : memref<2x8x8xf32, #tpu.memory_space<vmem>>, vector<2x8x8xf32>
    "tpu.trace_start"() <{level = 10 : i32, message = "bqd,bkd->bqk"}> : () -> ()
    %cst_13 = arith.constant dense<0.000000e+00> : vector<2x8x8xf32>
    %15 = tpu.matmul %13, %14, %cst_13 {dimension_numbers = #tpu.dot_dimension_numbers<[2], [2], [1], [1], [0, 0, 0, 1, 1, 1], [0], [0]>} : vector<2x8x8xf32>, vector<2x8x8xf32>, vector<2x8x8xf32> -> vector<2x8x8xf32>
    "tpu.trace_stop"() : () -> ()
    %cst_14 = arith.constant dense<0xFF800000> : vector<2x8xf32>
    %16 = vector.multi_reduction <maximumf>, %15, %cst_14 [2] : vector<2x8x8xf32> to vector<2x8xf32>
    %17 = vector.shape_cast %16 : vector<2x8xf32> to vector<2x8x1xf32>
    %18 = vector.broadcast %17 : vector<2x8x1xf32> to vector<2x8x8xf32>
    %19 = arith.subf %15, %18 : vector<2x8x8xf32>
    %20 = math.exp %19 : vector<2x8x8xf32>
    %cst_15 = arith.constant dense<0.000000e+00> : vector<2x8xf32>
    %21 = vector.multi_reduction <add>, %20, %cst_15 [2] : vector<2x8x8xf32> to vector<2x8xf32>
    %22 = vector.shape_cast %21 : vector<2x8xf32> to vector<2x8x1xf32>
    %c0_16 = arith.constant 0 : index
    %c0_17 = arith.constant 0 : index
    %c0_18 = arith.constant 0 : index
    %23 = vector.load %arg9[%c0_16, %c0_17, %c0_18] : memref<2x8x8xf32, #tpu.memory_space<vmem>>, vector<2x8x8xf32>
    "tpu.trace_start"() <{level = 10 : i32, message = "bqk,bkd->bqd"}> : () -> ()
    %cst_19 = arith.constant dense<0.000000e+00> : vector<2x8x8xf32>
    %24 = tpu.matmul %20, %23, %cst_19 {dimension_numbers = #tpu.dot_dimension_numbers<[2], [1], [1], [2], [0, 0, 0, 1, 1, 2], [0], [0]>} : vector<2x8x8xf32>, vector<2x8x8xf32>, vector<2x8x8xf32> -> vector<2x8x8xf32>
    "tpu.trace_stop"() : () -> ()
    %25 = tpu.reciprocal %22 : vector<2x8x1xf32> -> vector<2x8x1xf32>
    %26 = vector.broadcast %25 : vector<2x8x1xf32> to vector<2x8x8xf32>
    %27 = arith.mulf %24, %26 : vector<2x8x8xf32>
    %c0_20 = arith.constant 0 : index
    %c0_21 = arith.constant 0 : index
    %c0_22 = arith.constant 0 : index
    %28 = vector.load %arg7[%c0_20, %c0_21, %c0_22] : memref<2x8x8xf32, #tpu.memory_space<vmem>>, vector<2x8x8xf32>
    tpu.vector_store %arg7[%c0_20, %c0_21, %c0_22], %27 {strides = array<i32>} : memref<2x8x8xf32, #tpu.memory_space<vmem>>, vector<2x8x8xf32>,
    return
  }
  func.func @transform_0(%arg0: i32, %arg1: i32) -> (i32, i32, i32) {
    %c0_i32 = arith.constant 0 : i32
    %c0_i32_0 = arith.constant 0 : i32
    return %arg0, %arg1, %c0_i32 : i32, i32, i32
  }
  func.func @transform_1(%arg0: i32, %arg1: i32) -> (i32, i32, i32) {
    %c0_i32 = arith.constant 0 : i32
    %c0_i32_0 = arith.constant 0 : i32
    %c0_i32_1 = arith.constant 0 : i32
    return %arg0, %c0_i32, %c0_i32_0 : i32, i32, i32
  }
  func.func @transform_2(%arg0: i32, %arg1: i32) -> (i32, i32, i32) {
    %c0_i32 = arith.constant 0 : i32
    %c0_i32_0 = arith.constant 0 : i32
    %c0_i32_1 = arith.constant 0 : i32
    return %arg0, %c0_i32, %c0_i32_0 : i32, i32, i32
  }
  func.func @transform_3(%arg0: i32, %arg1: i32) -> (i32, i32, i32) {
    %c0_i32 = arith.constant 0 : i32
    %c0_i32_0 = arith.constant 0 : i32
    return %arg0, %arg1, %c0_i32 : i32, i32, i32
  }
  func.func @transform_4(%arg0: i32, %arg1: i32) -> (i32, i32, i32) {
    %c0_i32 = arith.constant 0 : i32
    %c0_i32_0 = arith.constant 0 : i32
    %c0_i32_1 = arith.constant 0 : i32
    %c0_i32_2 = arith.constant 0 : i32
    return %c0_i32, %c0_i32_0, %c0_i32_1 : i32, i32, i32
  }
  func.func @transform_5(%arg0: i32, %arg1: i32) -> (i32, i32, i32) {
    %c0_i32 = arith.constant 0 : i32
    %c0_i32_0 = arith.constant 0 : i32
    return %arg0, %arg1, %c0_i32 : i32, i32, i32
  }
}

</mosaic_0001>

<bundles_post_ra>
// kernel: tpu_custom_call.1
= control target key start
LH: loop header
LB: loop body
LE: loop exit
PB: predicated region body
PF: predicated region fallthrough
CT: control target
= control target key end

     0   :  { %vm34_vm0 = vcmask 261120   ;;  %v790_v3 = vmov 0   ;;  %s915_s0 = inlined_call_operand.vmem [shape: f32[2,8,32], index: 0, kind: input, shape index: {}]   ;;  %s916_s1 = inlined_call_operand.vmem [shape: f32[2,8,32], index: 1, kind: input, shape index: {}]   ;;  %s917_s2 = inlined_call_operand.vmem [shape: f32[2,8,32], index: 2, kind: input, shape index: {}]   ;;  %s918_s3 = inlined_call_operand.vmem [shape: f32[2,8,1], index: 3, kind: input, shape index: {}]   ;;  %s919_s4 = inlined_call_operand.vmem [shape: f32[3,32,8], index: 4, kind: input, shape index: {}]   ;;  %s920_s5 = inlined_call_operand.hbm [shape: f32[2,8,8], index: 5, kind: output, shape index: {}]  }
   0x1   :  { %v657_v0 = vld [vmem:[%s919_s4 + $0x38] sm:$0xff]  ;;  %v656_v1 = vld [vmem:[%s919_s4 + $0x30] sm:$0xff]  ;;  %v25_v2 = vld [vmem:[%s916_s1] sm:$0xff]  ;;  %759 = vset.pattern.permute.xlu0 %v790_v3 }
   0x2   :  { %700 = vmatprep.subr.mxu0 %v657_v0  ;;  %v655_v4 = vld [vmem:[%s919_s4 + $0x28] sm:$0xff]  ;;  %708 = vmatprep.mubr.msk.f32.mxu0 %vm34_vm0, %v25_v2  ;;  %v654_v5 = vld [vmem:[%s919_s4 + $0x20] sm:$0xff] }
   0x3   :  { %701 = vmatpush3.msra.mxu0 %v657_v0  ;;  %v295_v6 = vld [vmem:[%s918_s3] sm:$0xff]  ;;  %v296_v7 = vld [vmem:[%s918_s3 + $0x8] sm:$0xff] }
   0x4   :  { %702 = vmatprep.subr.mxu0 %v656_v1 }
   0x5   :  { %703 = vmatpush3.msra.mxu0 %v656_v1 }
   0x6   :  { %10 = vsyncpa [#allocation5], 0  ;;  %704 = vmatprep.subr.mxu0 %v655_v4  ;;  %v297_v8 = vmul.f32 0.35355338, %v295_v6  ;;  %v26_v9 = vld [vmem:[%s916_s1 + $0x8] sm:$0xff]  ;;  %v212_v10 = vld [vmem:[%s919_s4 + $0x18] sm:$0xff] }
   0x7   :  { %705 = vmatpush3.msra.mxu0 %v655_v4  ;;  %v207_v11 = vld [vmem:[%s915_s0] sm:$0xff]  ;;  %v298_v12 = vmul.f32 0.35355338, %v296_v7  ;;  %v211_v13 = vld [vmem:[%s919_s4 + $0x10] sm:$0xff]  ;;  %v210_v14 = vld [vmem:[%s919_s4 + $0x8] sm:$0xff]  ;;  %v791_v23 = vmov 0.0  }
   0x8   :  { %706 = vmatprep.subr.mxu0 %v654_v5  ;;  %301 = vperm.xlu0 %759, %v297_v8   ;;  %v209_v15 = vld [vmem:[%s919_s4] sm:$0xff]  ;;  %v208_v16 = vld [vmem:[%s915_s0 + $0x8] sm:$0xff]  ;;  %v663_v17 = vld [vmem:[%s919_s4 + $0x58] sm:$0xff]  ;;  %vm792_vm1 = vmmov 0   ;;  %vm202_vm2 = vcmask 64512  }
   0x9   :  { %707 = vmatpush3.msra.mxu0 %v654_v5  ;;  %711 = vmatprep.subr.mxu1 %v663_v17  ;;  %v662_v18 = vld [vmem:[%s919_s4 + $0x50] sm:$0xff]  ;;  %v661_v19 = vld [vmem:[%s919_s4 + $0x48] sm:$0xff]  ;;  %v660_v20 = vld [vmem:[%s919_s4 + $0x40] sm:$0xff] }
   0xa   :  { %709 = vmatmul.mubr.msk.f32.vlgmr.msra.gmra.mxu0 %vm34_vm0, %v26_v9  ;;  %722 = vmatprep.subr.mxu0 %v212_v10  ;;  %v27_v21 = vld [vmem:[%s917_s2] sm:$0xff]  ;;  %v28_v22 = vld [vmem:[%s917_s2 + $0x8] sm:$0xff]  ;;  %s793_s2 = smov [#allocation4]  }
   0xb   :  { %723 = vmatpush3.msra.mxu0 %v212_v10  ;;  %730 = vmatprep.mubr.msk.f32.mxu0 %vm34_vm0, %v207_v11  ;;  %s643_s4 = sshll.u32 %s793_s2, 4  ;;  %s644_s4 = int_to_ptr.vmem [resolvable:$true] %s643_s4 }
   0xc   :  { %724 = vmatprep.subr.mxu0 %v211_v13  ;;  %306 = vperm.xlu0 %759, %v298_v12   ;;  %s768_s30 = scalar_lea.vmem %s644_s4, 256  ;;  %p773_p1 = scmp.lt.s32.totalorder %s644_s4, %s644_s4 }
   0xd   :  { %725 = vmatpush3.msra.mxu0 %v211_v13  ;;  %712 = vmatpush3.msra.mxu1 %v663_v17  ;;  %p769_p0 = scmp.ne.s32.totalorder %s644_s4, %s768_s30  ;;  %p774_p2 = scmp.lt.s32.totalorder %s768_s30, %s768_s30 }
   0xe   :  { %726 = vmatprep.subr.mxu0 %v210_v14  ;;  %713 = vmatprep.subr.mxu1 %v662_v18 }
   0xf   :  { %727 = vmatpush3.msra.mxu0 %v210_v14  ;;  %714 = vmatpush3.msra.mxu1 %v662_v18  ;;  %p775_p3 = por %p774_p2, %p773_p1 }
  0x10   :  { %728 = vmatprep.subr.mxu0 %v209_v15  ;;  %715 = vmatprep.subr.mxu1 %v661_v19 }
  0x11   :  { %729 = vmatpush3.msra.mxu0 %v209_v15  ;;  %719 = vmatprep.mubr.msk.f32.mxu1 %vm34_vm0, %v27_v21  ;;  %p776_p4 = pnand %p775_p3, %p769_p0 }
  0x12   :  { %731 = vmatmul.mubr.msk.f32.vlgmr.msra.gmra.mxu0 %vm34_vm0, %v208_v16  ;;  %716 = vmatpush3.msra.mxu1 %v661_v19 }
  0x13   :  { %717 = vmatprep.subr.mxu1 %v660_v20  ;;  %743 = vmatprep.subr.mxu0 %v791_v23 }
  0x14   :  { %718 = vmatpush3.msra.mxu1 %v660_v20  ;;  %745 = vmatprep.mubr.msk.f32.mxu0 %vm792_vm1, %v791_v23 }
  0x15   :  { %720 = vmatmul.mubr.msk.f32.vlgmr.msra.gmra.mxu1 %vm34_vm0, %v28_v22  ;;  %733 = vmatprep.subr.mxu1 %v791_v23 }
  0x16   :  { %735 = vmatprep.mubr.msk.f32.mxu1 %vm792_vm1, %v791_v23 }
  0x83   :  { %v302_v26 = vpop.permute.xlu0 %301 }
  0x87   :  { %v307_v31 = vpop.permute.xlu0 %306 }
  0xca   :  { %v710_v24 = vpop.f32.mrf.mxu0 }
  0xcb   :  { %204 = vst.msk [vmem:[#allocation2 + $0x8] sm:$0xff] %vm202_vm2, %v710_v24 }
  0xcc   :  { %v107_v25 = vpop.f32.mrf.mxu0 }
  0xcd   :  { %203 = vst.msk [vmem:[#allocation2] sm:$0xff] %vm202_vm2, %v107_v25 }
  0xd2   :  { %v732_v27 = vpop.f32.mrf.mxu0  ;;  %v312_v32 = vld [vmem:[#allocation2 + $0x8] sm:$0xff] }
  0xd3   :  { %v310_v33 = vmul.f32 %v732_v27, %v307_v31 }
  0xd4   :  { %v286_v28 = vpop.f32.mrf.mxu0  ;;  %v311_v29 = vld [vmem:[#allocation2] sm:$0xff] }
  0xd5   :  { %v309_v30 = vmul.f32 %v302_v26, %v286_v28  ;;  %734 = vmatpush3.xpose.msk.msra.mxu1 %vm202_vm2, %v311_v29  ;;  %v721_v34 = vpop.f32.mrf.mxu1 }
  0xd6   :  { %738 = vmatprep.subr.mxu1 %v791_v23  ;;  %206 = vst.msk [vmem:[#allocation3 + $0x8] sm:$0xff] %vm202_vm2, %v721_v34 }
  0xd7   :  { %v193_v35 = vpop.f32.mrf.mxu1 }
  0xd8   :  { %736 = vmatmul.mubr.msk.f32.vlgmr.msra.gmra.mxu1 %vm202_vm2, %v309_v30  ;;  %205 = vst.msk [vmem:[#allocation3] sm:$0xff] %vm202_vm2, %v193_v35 }
  0xd9   :  { %739 = vmatpush3.xpose.msk.msra.mxu1 %vm202_vm2, %v312_v32  ;;  %740 = vmatprep.mubr.msk.f32.mxu1 %vm792_vm1, %v791_v23 }
  0xda   :  { %748 = vmatprep.subr.mxu1 %v791_v23 }
  0xdc   :  { %741 = vmatmul.mubr.msk.f32.vlgmr.msra.gmra.mxu1 %vm202_vm2, %v310_v33 }
  0xdd   :  { %750 = vmatprep.mubr.msk.f32.mxu1 %vm792_vm1, %v791_v23  ;;  %v485_v37 = vld [vmem:[#allocation3 + $0x8] sm:$0xff] }
  0xde   :  { %749 = vmatpush3.msra.mxu1 %v485_v37 }
  0xdf   :  { %v484_v36 = vld [vmem:[#allocation3] sm:$0xff] }
  0xe0   :  { %744 = vmatpush3.msra.mxu0 %v484_v36 }
 0x198   :  { %v386_v38 = vpop.f32.mrf.mxu1 }
 0x199   :  { %v466_v39 = vsel %vm202_vm2, %v386_v38, -inf }
 0x19a   :  { %467 = vmax.xlane.f32.xlu1 %v466_v39  ;;  %v737_v40 = vpop.f32.mrf.mxu1 }
 0x19c   :  { %v462_v41 = vpop.f32.mrf.mxu1 }
 0x19d   :  { %v469_v42 = vsel %vm202_vm2, %v462_v41, -inf }
 0x19e   :  { %470 = vmax.xlane.f32.xlu1 %v469_v42  ;;  %v742_v43 = vpop.f32.mrf.mxu1 }
 0x223   :  { %v468_v44 = vpop.xlane.xlu1 %467 }
 0x224   :  { %v472_v45 = vsub.f32 %v386_v38, %v468_v44 }
 0x226   :  { %v474_v46 = vmul.f32 1.442695, %v472_v45 }
 0x227   :  { %v471_v47 = vpop.xlane.xlu1 %470 }
 0x228   :  { %760 = vpow2.f32 %v474_v46  ;;  %v473_v48 = vsub.f32 %v462_v41, %v471_v47 }
 0x22a   :  { %v476_v49 = vmul.f32 1.442695, %v473_v48 }
 0x22c   :  { %762 = vpow2.f32 %v476_v49 }
 0x235   :  { %v761_v50 = vpop.eup %760 }
 0x236   :  { %746 = vmatmul.mubr.msk.f32.vlgmr.msra.gmra.mxu0 %vm202_vm2, %v761_v50  ;;  %v478_v51 = vsel %vm202_vm2, %v761_v50, 0.0 }
 0x237   :  { %479 = vadd.xlane.f32.xlu0 %v478_v51 }
 0x239   :  { %v763_v52 = vpop.eup %762 }
 0x23a   :  { %751 = vmatmul.mubr.msk.f32.vlgmr.msra.gmra.mxu1 %vm202_vm2, %v763_v52  ;;  %v481_v53 = vsel %vm202_vm2, %v763_v52, 0.0 }
 0x23b   :  { %482 = vadd.xlane.f32.xlu1 %v481_v53 }
 0x2c0   :  { %v480_v54 = vpop.xlane.xlu0 %479 }
 0x2c1   :  { %764 = vrcp.f32 %v480_v54 }
 0x2c4   :  { %v483_v55 = vpop.xlane.xlu1 %482 }
 0x2c5   :  { %766 = vrcp.f32 %v483_v55 }
 0x2ce   :  { %v765_v56 = vpop.eup %764 }
 0x2d2   :  { %v767_v60 = vpop.eup %766 }
 0x2f6   :  { %v555_v57 = vpop.f32.mrf.mxu0 }
 0x2f7   :  { %v634_v58 = vmul.f32 %v765_v56, %v555_v57 }
 0x2f8   :  { %v747_v59 = vpop.f32.mrf.mxu0 }
 0x2f9   :  { %636 = vst.msk [vmem:[#allocation4] sm:$0xff] %vm202_vm2, %v634_v58 }
 0x2fa   :  { %v628_v61 = vpop.f32.mrf.mxu1 }
 0x2fb   :  { %v635_v62 = vmul.f32 %v767_v60, %v628_v61 }
 0x2fc   :  { %v752_v63 = vpop.f32.mrf.mxu1 }
 0x2fd   :  { %637 = vst.msk [vmem:[#allocation4 + $0x8] sm:$0xff] %vm202_vm2, %v635_v62 }
 0x2fe   :  { %779 = shalt.err (!%p776_p4)
}
 0x2ff   :  { %s794_s6 = smov 128   ;;  %s795_s7 = smov 8  }
 0x300   :  { %649 = dma.vmem_to_hbm [thread:$0]  %s644_s4, 256, %s920_s5, [#allocation5], %s794_s6, %s794_s6, %s795_s7  }
 0x301   :  { %788 = dma.done.wait [#allocation5], 256  }
 0x302   :  { %789 = vsyncadd [#allocation5], 4294967040 }
 0x303   :  { %653 = vsyncpa [#allocation5], 1 }

</bundles_post_ra>
